<compile_context>
chip_gen: v6e
topology: v6e:2x2x1
jax: 0.10.0
libtpu: 0.0.40
codegen_flags: <defaults>
</compile_context>

<pallas_src>
import jax
import jax.numpy as jnp
from jax.experimental import pallas as pl
from jax.experimental.pallas import tpu as pltpu


# ----------------------------------------------------------------------------
# Pallas kernel factory: conv/bn/relu/max/concat/conv5 for one (batch, N-tile).
# ----------------------------------------------------------------------------
def make_dgcnn_kernel(bf16_tail):
    """bf16_tail=True runs the bias/ReLU/max tail in bf16 (v6e/v7x only)."""
    cdt = jnp.bfloat16 if bf16_tail else jnp.float32

    def to_mxu(a):
        return a if a.dtype == jnp.bfloat16 else a.astype(jnp.bfloat16)

    def kernel(neigh_ref, cent_ref,
               w1n_ref, w1c_ref, b1_ref,
               w2_ref, b2_ref,
               w3_ref, b3_ref,
               w4_ref, b4_ref,
               w5_ref, b5_ref,
               out_ref):
        k, t, c_in = neigh_ref.shape          # static python ints
        c1 = w1n_ref.shape[1]                 # lane-padded conv1 width (128)

        def max_over_k(h):
            # h: (K*T, C) -> (T, C); unrolled elementwise max over K row-slabs.
            m = h[0:t, :]
            for j in range(1, k):
                m = jnp.maximum(m, h[j * t:(j + 1) * t, :])
            return m

        def conv_bn_relu(h, w_ref, b_ref):
            # 1x1 conv (BN scale folded into the bf16 weight) on the MXU with
            # f32 accumulation; bias add + ReLU in the tail dtype on the VPU.
            y = jnp.dot(to_mxu(h), w_ref[...], preferred_element_type=jnp.float32)
            return jnp.maximum(y.astype(cdt) + b_ref[...].astype(cdt), 0.0)

        # ---- conv1, split into neighbour / centre matmuls (contraction dim 3).
        # Centre term + bias computed once per point and broadcast over K.
        neigh = neigh_ref[...].reshape(k * t, c_in)                    # (K*T, 3)
        y_n = jnp.dot(neigh, w1n_ref[...], preferred_element_type=jnp.float32)
        y_c = jnp.dot(cent_ref[...], w1c_ref[...], preferred_element_type=jnp.float32)
        y_cb = (y_c + b1_ref[...]).astype(cdt)                         # (T, 128)
        h1 = jnp.maximum(y_n.astype(cdt).reshape(k, t, c1) + y_cb[None], 0.0)
        x1 = h1[0]
        for j in range(1, k):                                          # max over K
            x1 = jnp.maximum(x1, h1[j])                                # (T, 128)
        h1 = h1.reshape(k * t, c1)                                     # (K*T, 128)

        h2 = conv_bn_relu(h1, w2_ref, b2_ref)                          # (K*T, 128)
        x2 = max_over_k(h2)                                            # (T, 128)
        h3 = conv_bn_relu(h2, w3_ref, b3_ref)                          # (K*T, 128)
        x3 = max_over_k(h3)                                            # (T, 128)

        # ---- conv4: max over K on the raw MXU accumulator, then bias + ReLU
        # once on (T, 256).  h4 is never fed to another conv, so this is exact.
        y4 = jnp.dot(to_mxu(h3), w4_ref[...], preferred_element_type=jnp.float32)
        x4 = jnp.maximum(max_over_k(y4) + b4_ref[...], 0.0)            # (T, 256) f32

        # ---- conv5 as a single matmul on lane-concat(x1, x2, x3, x4).
        # Concat offsets are 128-aligned; padded rows of w5 are zero.
        xcat = jnp.concatenate(
            [to_mxu(x1), to_mxu(x2), to_mxu(x3), to_mxu(x4)], axis=-1)  # (T, 640)
        acc = jnp.dot(xcat, w5_ref[...], preferred_element_type=jnp.float32)
        out = jnp.maximum(acc + b5_ref[...], 0.0)                      # (T, E) f32
        # Emit the (E, T) layout directly — no standalone XLA transpose needed.
        out_ref[...] = jnp.transpose(out, (1, 0))

    return kernel


def _supports_bf16_valu():
    # v6e / v7x have bf16-capable VALUs; v5e and earlier do not.
    try:
        kind = jax.devices()[0].device_kind.lower()
    except Exception:
        return False
    return not any(tag in kind for tag in ("v2", "v3", "v4", "v5"))


# ----------------------------------------------------------------------------
# JAX glue: kNN graph feature (DCP's get_graph_feature = cat((neighbor, center)))
# returned split as neighbours (B, K, N, C) and centres (B, N, C).
# ----------------------------------------------------------------------------
def get_graph_feature_split(x, k):
    # x: (B, C, N), same as the PyTorch input to DGCNN.forward
    B, C, N = x.shape
    xt = jnp.transpose(x, (0, 2, 1))                          # (B, N, C)
    inner = -2.0 * jnp.einsum("bnc,bmc->bnm", xt, xt)
    xx = jnp.sum(xt * xt, axis=-1)                            # (B, N)
    pairwise = -xx[:, :, None] - inner - xx[:, None, :]       # (B, N, N)
    idx = jax.lax.top_k(pairwise, k)[1]                       # (B, N, k)
    neighbors = jax.vmap(lambda pts, ind: pts[ind])(xt, idx)  # (B, N, k, C)
    neighbors = jnp.transpose(neighbors, (0, 2, 1, 3))        # (B, K, N, C)
    return neighbors, xt                                      # centres = (B, N, C)


# ----------------------------------------------------------------------------
# Parameter setup: deterministic conv weights + BN stats, BN folded (eval mode).
# ----------------------------------------------------------------------------
def init_params(key, emb_dims):
    dims = [(6, 64), (64, 64), (64, 128), (128, 256), (512, emb_dims)]
    eps = 1e-5
    weights, shifts = [], []
    for cin, cout in dims:
        key, kw, kg, kb, km, kv = jax.random.split(key, 6)
        w = jax.random.normal(kw, (cin, cout), jnp.float32) / jnp.sqrt(float(cin))
        gamma = 1.0 + 0.1 * jax.random.normal(kg, (cout,), jnp.float32)
        beta = 0.1 * jax.random.normal(kb, (cout,), jnp.float32)
        mean = 0.1 * jax.random.normal(km, (cout,), jnp.float32)
        var = jnp.abs(jax.random.normal(kv, (cout,), jnp.float32)) + 0.5
        scale = gamma / jnp.sqrt(var + eps)
        weights.append(w * scale[None, :])              # fold BN scale into conv
        shifts.append((beta - mean * scale)[None, :])   # per-channel shift (1, cout)
    return weights, shifts


def pack_params(weights, shifts):
    """Pad 64-channel layers to 128 lanes, split conv1 (neighbour/centre),
    fuse conv5's weight into one (640, E) row-block matrix matching
    lane-concat(x1_pad, x2_pad, x3, x4), cast matmul weights to bf16."""
    w1, w2, w3, w4, w5 = weights
    b1, b2, b3, b4, b5 = shifts
    bf = jnp.bfloat16

    def pad_cols(a, cols):
        return jnp.pad(a, ((0, 0), (0, cols - a.shape[1])))

    def pad_rows(a, rows):
        return jnp.pad(a, ((0, rows - a.shape[0]), (0, 0)))

    w1p = pad_cols(w1, 128)                                   # (6, 128)
    w1n = w1p[0:3, :].astype(bf)                              # neighbour half
    w1c = w1p[3:6, :].astype(bf)                              # centre half
    b1p = pad_cols(b1, 128)

    w2p = pad_cols(pad_rows(w2, 128), 128).astype(bf)         # (128, 128)
    b2p = pad_cols(b2, 128)
    w3p = pad_rows(w3, 128).astype(bf)                        # (128, 128)
    b3p = b3                                                  # (1, 128)
    w4p = w4.astype(bf)                                       # (128, 256)
    b4p = b4                                                  # (1, 256)

    # Single fused conv5 weight (640, E): rows ordered to match
    # lane-concat(x1_pad128, x2_pad128, x3, x4); padded rows are zero.
    w5f = jnp.concatenate([pad_rows(w5[0:64, :], 128),
                           pad_rows(w5[64:128, :], 128),
                           w5[128:256, :],
                           w5[256:512, :]], axis=0).astype(bf)  # (640, E)
    return (w1n, w1c, b1p, w2p, b2p, w3p, b3p, w4p, b4p, w5f, b5)


# ----------------------------------------------------------------------------
# Wrapper calling pallas_call with a (B, N-tile) grid; output is (B, E, N).
# ----------------------------------------------------------------------------
def dgcnn_pallas(neighbors, centers, params, *, tile_n=256, bf16_tail=None):
    B, K, N, C = neighbors.shape
    E = params[-1].shape[1]
    if bf16_tail is None:
        bf16_tail = _supports_bf16_valu()

    tile_n = min(tile_n, N)
    if N % tile_n != 0 or (tile_n != N and tile_n % 128 != 0):
        tile_n = N      # small / odd N: single tile over the point axis
    grid = (B, N // tile_n)

    def wspec(shape):
        ndim = len(shape)
        return pl.BlockSpec(shape, lambda b, i, _n=ndim: (0,) * _n)

    in_specs = [
        pl.BlockSpec((None, K, tile_n, C), lambda b, i: (b, 0, i, 0)),  # neighbours
        pl.BlockSpec((None, tile_n, C), lambda b, i: (b, i, 0)),        # centres
    ] + [wspec(p.shape) for p in params]

    cost = pl.CostEstimate(
        flops=2 * B * N * (K * (3 * 64 + 64 * 64 + 64 * 128 + 128 * 256)
                           + 3 * 64 + 512 * E),
        transcendentals=0,
        bytes_accessed=int(neighbors.size * neighbors.dtype.itemsize
                           + centers.size * centers.dtype.itemsize
                           + 4 * B * N * E
                           + sum(int(p.size) * p.dtype.itemsize for p in params)))

    out = pl.pallas_call(
        make_dgcnn_kernel(bf16_tail),
        out_shape=jax.ShapeDtypeStruct((B, E, N), jnp.float32),
        grid=grid,
        in_specs=in_specs,
        out_specs=pl.BlockSpec((None, E, tile_n), lambda b, i: (b, 0, i)),
        compiler_params=pltpu.CompilerParams(
            dimension_semantics=("parallel", "parallel"),
            vmem_limit_bytes=48 * 1024 * 1024),
        cost_estimate=cost,
    )(neighbors, centers, *params)
    return out      # already (B, emb_dims, N) — PyTorch convention


# ----------------------------------------------------------------------------
# Pure-JAX reference (same math, unpadded weights) for a correctness check.
# Weights are bf16-quantized like the kernel; activations stay f32, so only
# intermediate rounding differs.
# ----------------------------------------------------------------------------
def reference_forward(neighbors, centers, weights, shifts):
    nb = neighbors.astype(jnp.float32)                            # (B, K, N, 3)
    ct = jnp.broadcast_to(centers.astype(jnp.float32)[:, None], nb.shape)
    h = jnp.concatenate([nb, ct], axis=-1)                        # (B, K, N, 6)
    xs = []
    for w, s in zip(weights[:4], shifts[:4]):
        w_q = w.astype(jnp.bfloat16).astype(jnp.float32)
        h = jnp.maximum(h @ w_q + s, 0.0)
        xs.append(jnp.max(h, axis=1))                             # max over K
    cat = jnp.concatenate(xs, axis=-1)                            # (B, N, 512)
    w5_q = weights[4].astype(jnp.bfloat16).astype(jnp.float32)
    out = jnp.maximum(cat @ w5_q + shifts[4], 0.0)                # (B, N, E)
    return jnp.transpose(out, (0, 2, 1))                          # (B, E, N)


if __name__ == "__main__":
    B, C, N, K, EMB = 2, 3, 16, 4, 128   # small shapes; module default emb_dims=512
    key = jax.random.PRNGKey(0)
    kx, kp = jax.random.split(key)
    x = jax.random.normal(kx, (B, C, N), jnp.float32)     # PyTorch input (B, 3, N)
    weights, shifts = init_params(kp, EMB)
    params = pack_params(weights, shifts)

    neighbors, centers = get_graph_feature_split(x, K)    # f32 kNN in XLA
    neighbors = neighbors.astype(jnp.bfloat16)            # halve input DMA traffic
    centers = centers.astype(jnp.bfloat16)

    out = dgcnn_pallas(neighbors, centers, params)
    out = jax.block_until_ready(out)

    assert out.shape == (B, EMB, N), out.shape
    ref = reference_forward(neighbors, centers, weights, shifts)
    err = float(jnp.max(jnp.abs(out - ref)))
    assert jnp.allclose(out, ref, rtol=4e-2, atol=4e-2), err
    print("KERNEL_OK")
</pallas_src>

<mosaic_0001>
module attributes {stable_mosaic.version = 11 : i64} {
  func.func @kernel(%arg0: i32, %arg1: i32, %arg2: memref<1x4x16x3xbf16, #tpu.memory_space<vmem>>, %arg3: memref<1x16x3xbf16, #tpu.memory_space<vmem>>, %arg4: memref<3x128xbf16, #tpu.memory_space<vmem>>, %arg5: memref<3x128xbf16, #tpu.memory_space<vmem>>, %arg6: memref<1x128xf32, #tpu.memory_space<vmem>>, %arg7: memref<128x128xbf16, #tpu.memory_space<vmem>>, %arg8: memref<1x128xf32, #tpu.memory_space<vmem>>, %arg9: memref<128x128xbf16, #tpu.memory_space<vmem>>, %arg10: memref<1x128xf32, #tpu.memory_space<vmem>>, %arg11: memref<128x256xbf16, #tpu.memory_space<vmem>>, %arg12: memref<1x256xf32, #tpu.memory_space<vmem>>, %arg13: memref<640x128xbf16, #tpu.memory_space<vmem>>, %arg14: memref<1x128xf32, #tpu.memory_space<vmem>>, %arg15: memref<1x128x16xf32, #tpu.memory_space<vmem>>) attributes {dimension_semantics = [#tpu.dimension_semantics<parallel>, #tpu.dimension_semantics<parallel>], iteration_bounds = array<i64: 2, 1>, scalar_prefetch = 0 : i64, scratch_operands = 0 : i64, tpu.core_type = #tpu.core_type<tc>, window_params = [{transform_indices = @transform_0, window_bounds = array<i64: 1, 4, 16, 3>}, {transform_indices = @transform_1, window_bounds = array<i64: 1, 16, 3>}, {pipeline_mode = #tpu.pipeline_mode<synchronous>, transform_indices = @transform_2, window_bounds = array<i64: 3, 128>}, {pipeline_mode = #tpu.pipeline_mode<synchronous>, transform_indices = @transform_3, window_bounds = array<i64: 3, 128>}, {pipeline_mode = #tpu.pipeline_mode<synchronous>, transform_indices = @transform_4, window_bounds = array<i64: 1, 128>}, {pipeline_mode = #tpu.pipeline_mode<synchronous>, transform_indices = @transform_5, window_bounds = array<i64: 128, 128>}, {pipeline_mode = #tpu.pipeline_mode<synchronous>, transform_indices = @transform_6, window_bounds = array<i64: 1, 128>}, {pipeline_mode = #tpu.pipeline_mode<synchronous>, transform_indices = @transform_7, window_bounds = array<i64: 128, 128>}, {pipeline_mode = #tpu.pipeline_mode<synchronous>, transform_indices = @transform_8, window_bounds = array<i64: 1, 128>}, {pipeline_mode = #tpu.pipeline_mode<synchronous>, transform_indices = @transform_9, window_bounds = array<i64: 128, 256>}, {pipeline_mode = #tpu.pipeline_mode<synchronous>, transform_indices = @transform_10, window_bounds = array<i64: 1, 256>}, {pipeline_mode = #tpu.pipeline_mode<synchronous>, transform_indices = @transform_11, window_bounds = array<i64: 640, 128>}, {pipeline_mode = #tpu.pipeline_mode<synchronous>, transform_indices = @transform_12, window_bounds = array<i64: 1, 128>}, {transform_indices = @transform_13, window_bounds = array<i64: 1, 128, 16>}]} {
    %c0 = arith.constant 0 : index
    %c0_0 = arith.constant 0 : index
    %c0_1 = arith.constant 0 : index
    %c0_2 = arith.constant 0 : index
    %0 = vector.load %arg2[%c0, %c0_0, %c0_1, %c0_2] : memref<1x4x16x3xbf16, #tpu.memory_space<vmem>>, vector<1x4x16x3xbf16>
    %1 = vector.shape_cast %0 : vector<1x4x16x3xbf16> to vector<4x16x3xbf16>
    %2 = vector.shape_cast %1 : vector<4x16x3xbf16> to vector<64x3xbf16>
    %c0_3 = arith.constant 0 : index
    %c0_4 = arith.constant 0 : index
    %3 = vector.load %arg4[%c0_3, %c0_4] : memref<3x128xbf16, #tpu.memory_space<vmem>>, vector<3x128xbf16>
    %cst = arith.constant dense<0.000000e+00> : vector<64x128xf32>
    %4 = tpu.matmul %2, %3, %cst {dimension_numbers = #tpu.dot_dimension_numbers<[1], [0], [0], [1], [0, 0, 1, 1], [], []>} : vector<64x3xbf16>, vector<3x128xbf16>, vector<64x128xf32> -> vector<64x128xf32>
    %c0_5 = arith.constant 0 : index
    %c0_6 = arith.constant 0 : index
    %c0_7 = arith.constant 0 : index
    %5 = vector.load %arg3[%c0_5, %c0_6, %c0_7] : memref<1x16x3xbf16, #tpu.memory_space<vmem>>, vector<1x16x3xbf16>
    %6 = vector.shape_cast %5 : vector<1x16x3xbf16> to vector<16x3xbf16>
    %c0_8 = arith.constant 0 : index
    %c0_9 = arith.constant 0 : index
    %7 = vector.load %arg5[%c0_8, %c0_9] : memref<3x128xbf16, #tpu.memory_space<vmem>>, vector<3x128xbf16>
    %cst_10 = arith.constant dense<0.000000e+00> : vector<16x128xf32>
    %8 = tpu.matmul %6, %7, %cst_10 {dimension_numbers = #tpu.dot_dimension_numbers<[1], [0], [0], [1], [0, 0, 1, 1], [], []>} : vector<16x3xbf16>, vector<3x128xbf16>, vector<16x128xf32> -> vector<16x128xf32>
    %c0_11 = arith.constant 0 : index
    %c0_12 = arith.constant 0 : index
    %9 = vector.load %arg6[%c0_11, %c0_12] : memref<1x128xf32, #tpu.memory_space<vmem>>, vector<1x128xf32>
    %10 = vector.broadcast %9 : vector<1x128xf32> to vector<16x128xf32>
    %11 = arith.addf %8, %10 : vector<16x128xf32>
    %12 = arith.truncf %11 : vector<16x128xf32> to vector<16x128xbf16>
    %13 = arith.truncf %4 : vector<64x128xf32> to vector<64x128xbf16>
    %14 = vector.shape_cast %13 : vector<64x128xbf16> to vector<4x16x128xbf16>
    %15 = vector.shape_cast %12 : vector<16x128xbf16> to vector<1x16x128xbf16>
    %16 = vector.broadcast %15 : vector<1x16x128xbf16> to vector<4x16x128xbf16>
    %17 = arith.addf %14, %16 : vector<4x16x128xbf16>
    %cst_13 = arith.constant 0.000000e+00 : bf16
    %18 = vector.broadcast %cst_13 : bf16 to vector<4x16x128xbf16>
    %19 = arith.maximumf %17, %18 : vector<4x16x128xbf16>
    %20 = vector.extract_strided_slice %19 {offsets = [0, 0, 0], sizes = [1, 16, 128], strides = [1, 1, 1]} : vector<4x16x128xbf16> to vector<1x16x128xbf16>
    %21 = vector.shape_cast %20 : vector<1x16x128xbf16> to vector<16x128xbf16>
    %22 = vector.extract_strided_slice %19 {offsets = [1, 0, 0], sizes = [1, 16, 128], strides = [1, 1, 1]} : vector<4x16x128xbf16> to vector<1x16x128xbf16>
    %23 = vector.shape_cast %22 : vector<1x16x128xbf16> to vector<16x128xbf16>
    %24 = arith.maximumf %21, %23 : vector<16x128xbf16>
    %25 = vector.extract_strided_slice %19 {offsets = [2, 0, 0], sizes = [1, 16, 128], strides = [1, 1, 1]} : vector<4x16x128xbf16> to vector<1x16x128xbf16>
    %26 = vector.shape_cast %25 : vector<1x16x128xbf16> to vector<16x128xbf16>
    %27 = arith.maximumf %24, %26 : vector<16x128xbf16>
    %28 = vector.extract_strided_slice %19 {offsets = [3, 0, 0], sizes = [1, 16, 128], strides = [1, 1, 1]} : vector<4x16x128xbf16> to vector<1x16x128xbf16>
    %29 = vector.shape_cast %28 : vector<1x16x128xbf16> to vector<16x128xbf16>
    %30 = arith.maximumf %27, %29 : vector<16x128xbf16>
    %31 = vector.shape_cast %19 : vector<4x16x128xbf16> to vector<64x128xbf16>
    %c0_14 = arith.constant 0 : index
    %c0_15 = arith.constant 0 : index
    %32 = vector.load %arg7[%c0_14, %c0_15] : memref<128x128xbf16, #tpu.memory_space<vmem>>, vector<128x128xbf16>
    %cst_16 = arith.constant dense<0.000000e+00> : vector<64x128xf32>
    %33 = tpu.matmul %31, %32, %cst_16 {dimension_numbers = #tpu.dot_dimension_numbers<[1], [0], [0], [1], [0, 0, 1, 1], [], []>} : vector<64x128xbf16>, vector<128x128xbf16>, vector<64x128xf32> -> vector<64x128xf32>
    %34 = arith.truncf %33 : vector<64x128xf32> to vector<64x128xbf16>
    %c0_17 = arith.constant 0 : index
    %c0_18 = arith.constant 0 : index
    %35 = vector.load %arg8[%c0_17, %c0_18] : memref<1x128xf32, #tpu.memory_space<vmem>>, vector<1x128xf32>
    %36 = arith.truncf %35 : vector<1x128xf32> to vector<1x128xbf16>
    %37 = vector.broadcast %36 : vector<1x128xbf16> to vector<64x128xbf16>
    %38 = arith.addf %34, %37 : vector<64x128xbf16>
    %cst_19 = arith.constant 0.000000e+00 : bf16
    %39 = vector.broadcast %cst_19 : bf16 to vector<64x128xbf16>
    %40 = arith.maximumf %38, %39 : vector<64x128xbf16>
    %41 = vector.extract_strided_slice %40 {offsets = [0, 0], sizes = [16, 128], strides = [1, 1]} : vector<64x128xbf16> to vector<16x128xbf16>
    %42 = vector.extract_strided_slice %40 {offsets = [16, 0], sizes = [16, 128], strides = [1, 1]} : vector<64x128xbf16> to vector<16x128xbf16>
    %43 = arith.maximumf %41, %42 : vector<16x128xbf16>
    %44 = vector.extract_strided_slice %40 {offsets = [32, 0], sizes = [16, 128], strides = [1, 1]} : vector<64x128xbf16> to vector<16x128xbf16>
    %45 = arith.maximumf %43, %44 : vector<16x128xbf16>
    %46 = vector.extract_strided_slice %40 {offsets = [48, 0], sizes = [16, 128], strides = [1, 1]} : vector<64x128xbf16> to vector<16x128xbf16>
    %47 = arith.maximumf %45, %46 : vector<16x128xbf16>
    %c0_20 = arith.constant 0 : index
    %c0_21 = arith.constant 0 : index
    %48 = vector.load %arg9[%c0_20, %c0_21] : memref<128x128xbf16, #tpu.memory_space<vmem>>, vector<128x128xbf16>
    %cst_22 = arith.constant dense<0.000000e+00> : vector<64x128xf32>
    %49 = tpu.matmul %40, %48, %cst_22 {dimension_numbers = #tpu.dot_dimension_numbers<[1], [0], [0], [1], [0, 0, 1, 1], [], []>} : vector<64x128xbf16>, vector<128x128xbf16>, vector<64x128xf32> -> vector<64x128xf32>
    %50 = arith.truncf %49 : vector<64x128xf32> to vector<64x128xbf16>
    %c0_23 = arith.constant 0 : index
    %c0_24 = arith.constant 0 : index
    %51 = vector.load %arg10[%c0_23, %c0_24] : memref<1x128xf32, #tpu.memory_space<vmem>>, vector<1x128xf32>
    %52 = arith.truncf %51 : vector<1x128xf32> to vector<1x128xbf16>
    %53 = vector.broadcast %52 : vector<1x128xbf16> to vector<64x128xbf16>
    %54 = arith.addf %50, %53 : vector<64x128xbf16>
    %cst_25 = arith.constant 0.000000e+00 : bf16
    %55 = vector.broadcast %cst_25 : bf16 to vector<64x128xbf16>
    %56 = arith.maximumf %54, %55 : vector<64x128xbf16>
    %57 = vector.extract_strided_slice %56 {offsets = [0, 0], sizes = [16, 128], strides = [1, 1]} : vector<64x128xbf16> to vector<16x128xbf16>
    %58 = vector.extract_strided_slice %56 {offsets = [16, 0], sizes = [16, 128], strides = [1, 1]} : vector<64x128xbf16> to vector<16x128xbf16>
    %59 = arith.maximumf %57, %58 : vector<16x128xbf16>
    %60 = vector.extract_strided_slice %56 {offsets = [32, 0], sizes = [16, 128], strides = [1, 1]} : vector<64x128xbf16> to vector<16x128xbf16>
    %61 = arith.maximumf %59, %60 : vector<16x128xbf16>
    %62 = vector.extract_strided_slice %56 {offsets = [48, 0], sizes = [16, 128], strides = [1, 1]} : vector<64x128xbf16> to vector<16x128xbf16>
    %63 = arith.maximumf %61, %62 : vector<16x128xbf16>
    %c0_26 = arith.constant 0 : index
    %c0_27 = arith.constant 0 : index
    %64 = vector.load %arg11[%c0_26, %c0_27] : memref<128x256xbf16, #tpu.memory_space<vmem>>, vector<128x256xbf16>
    %cst_28 = arith.constant dense<0.000000e+00> : vector<64x256xf32>
    %65 = tpu.matmul %56, %64, %cst_28 {dimension_numbers = #tpu.dot_dimension_numbers<[1], [0], [0], [1], [0, 0, 1, 1], [], []>} : vector<64x128xbf16>, vector<128x256xbf16>, vector<64x256xf32> -> vector<64x256xf32>
    %66 = vector.extract_strided_slice %65 {offsets = [0, 0], sizes = [16, 256], strides = [1, 1]} : vector<64x256xf32> to vector<16x256xf32>
    %67 = vector.extract_strided_slice %65 {offsets = [16, 0], sizes = [16, 256], strides = [1, 1]} : vector<64x256xf32> to vector<16x256xf32>
    %68 = arith.maximumf %66, %67 : vector<16x256xf32>
    %69 = vector.extract_strided_slice %65 {offsets = [32, 0], sizes = [16, 256], strides = [1, 1]} : vector<64x256xf32> to vector<16x256xf32>
    %70 = arith.maximumf %68, %69 : vector<16x256xf32>
    %71 = vector.extract_strided_slice %65 {offsets = [48, 0], sizes = [16, 256], strides = [1, 1]} : vector<64x256xf32> to vector<16x256xf32>
    %72 = arith.maximumf %70, %71 : vector<16x256xf32>
    %c0_29 = arith.constant 0 : index
    %c0_30 = arith.constant 0 : index
    %73 = vector.load %arg12[%c0_29, %c0_30] : memref<1x256xf32, #tpu.memory_space<vmem>>, vector<1x256xf32>
    %74 = vector.broadcast %73 : vector<1x256xf32> to vector<16x256xf32>
    %75 = arith.addf %72, %74 : vector<16x256xf32>
    %cst_31 = arith.constant 0.000000e+00 : f32
    %76 = vector.broadcast %cst_31 : f32 to vector<16x256xf32>
    %77 = arith.maximumf %75, %76 : vector<16x256xf32>
    %78 = arith.truncf %77 : vector<16x256xf32> to vector<16x256xbf16>
    %79 = tpu.concatenate %30, %47, %63, %78 in 1 : vector<16x128xbf16>, vector<16x128xbf16>, vector<16x128xbf16>, vector<16x256xbf16> -> vector<16x640xbf16>
    %c0_32 = arith.constant 0 : index
    %c0_33 = arith.constant 0 : index
    %80 = vector.load %arg13[%c0_32, %c0_33] : memref<640x128xbf16, #tpu.memory_space<vmem>>, vector<640x128xbf16>
    %cst_34 = arith.constant dense<0.000000e+00> : vector<16x128xf32>
    %81 = tpu.matmul %79, %80, %cst_34 {dimension_numbers = #tpu.dot_dimension_numbers<[1], [0], [0], [1], [0, 0, 1, 1], [], []>} : vector<16x640xbf16>, vector<640x128xbf16>, vector<16x128xf32> -> vector<16x128xf32>
    %c0_35 = arith.constant 0 : index
    %c0_36 = arith.constant 0 : index
    %82 = vector.load %arg14[%c0_35, %c0_36] : memref<1x128xf32, #tpu.memory_space<vmem>>, vector<1x128xf32>
    %83 = vector.broadcast %82 : vector<1x128xf32> to vector<16x128xf32>
    %84 = arith.addf %81, %83 : vector<16x128xf32>
    %cst_37 = arith.constant 0.000000e+00 : f32
    %85 = vector.broadcast %cst_37 : f32 to vector<16x128xf32>
    %86 = arith.maximumf %84, %85 : vector<16x128xf32>
    %87 = tpu.transpose %86, [1, 0] : vector<16x128xf32> -> vector<128x16xf32>
    %c0_38 = arith.constant 0 : index
    %c0_39 = arith.constant 0 : index
    %c0_40 = arith.constant 0 : index
    %88 = vector.load %arg15[%c0_38, %c0_39, %c0_40] : memref<1x128x16xf32, #tpu.memory_space<vmem>>, vector<1x128x16xf32>
    %89 = vector.shape_cast %88 : vector<1x128x16xf32> to vector<128x16xf32>
    %90 = vector.shape_cast %87 : vector<128x16xf32> to vector<1x128x16xf32>
    tpu.vector_store %arg15[%c0_38, %c0_39, %c0_40], %90 {strides = array<i32>} : memref<1x128x16xf32, #tpu.memory_space<vmem>>, vector<1x128x16xf32>,
    return
  }
  func.func @transform_0(%arg0: i32, %arg1: i32) -> (i32, i32, i32, i32) {
    %c0_i32 = arith.constant 0 : i32
    %c0_i32_0 = arith.constant 0 : i32
    %c0_i32_1 = arith.constant 0 : i32
    return %arg0, %c0_i32, %arg1, %c0_i32_0 : i32, i32, i32, i32
  }
  func.func @transform_1(%arg0: i32, %arg1: i32) -> (i32, i32, i32) {
    %c0_i32 = arith.constant 0 : i32
    %c0_i32_0 = arith.constant 0 : i32
    return %arg0, %arg1, %c0_i32 : i32, i32, i32
  }
  func.func @transform_2(%arg0: i32, %arg1: i32) -> (i32, i32) {
    %c0_i32 = arith.constant 0 : i32
    %c0_i32_0 = arith.constant 0 : i32
    %c0_i32_1 = arith.constant 0 : i32
    return %c0_i32, %c0_i32_0 : i32, i32
  }
  func.func @transform_3(%arg0: i32, %arg1: i32) -> (i32, i32) {
    %c0_i32 = arith.constant 0 : i32
    %c0_i32_0 = arith.constant 0 : i32
    %c0_i32_1 = arith.constant 0 : i32
    return %c0_i32, %c0_i32_0 : i32, i32
  }
  func.func @transform_4(%arg0: i32, %arg1: i32) -> (i32, i32) {
    %c0_i32 = arith.constant 0 : i32
    %c0_i32_0 = arith.constant 0 : i32
    %c0_i32_1 = arith.constant 0 : i32
    return %c0_i32, %c0_i32_0 : i32, i32
  }
  func.func @transform_5(%arg0: i32, %arg1: i32) -> (i32, i32) {
    %c0_i32 = arith.constant 0 : i32
    %c0_i32_0 = arith.constant 0 : i32
    %c0_i32_1 = arith.constant 0 : i32
    return %c0_i32, %c0_i32_0 : i32, i32
  }
  func.func @transform_6(%arg0: i32, %arg1: i32) -> (i32, i32) {
    %c0_i32 = arith.constant 0 : i32
    %c0_i32_0 = arith.constant 0 : i32
    %c0_i32_1 = arith.constant 0 : i32
    return %c0_i32, %c0_i32_0 : i32, i32
  }
  func.func @transform_7(%arg0: i32, %arg1: i32) -> (i32, i32) {
    %c0_i32 = arith.constant 0 : i32
    %c0_i32_0 = arith.constant 0 : i32
    %c0_i32_1 = arith.constant 0 : i32
    return %c0_i32, %c0_i32_0 : i32, i32
  }
  func.func @transform_8(%arg0: i32, %arg1: i32) -> (i32, i32) {
    %c0_i32 = arith.constant 0 : i32
    %c0_i32_0 = arith.constant 0 : i32
    %c0_i32_1 = arith.constant 0 : i32
    return %c0_i32, %c0_i32_0 : i32, i32
  }
  func.func @transform_9(%arg0: i32, %arg1: i32) -> (i32, i32) {
    %c0_i32 = arith.constant 0 : i32
    %c0_i32_0 = arith.constant 0 : i32
    %c0_i32_1 = arith.constant 0 : i32
    return %c0_i32, %c0_i32_0 : i32, i32
  }
  func.func @transform_10(%arg0: i32, %arg1: i32) -> (i32, i32) {
    %c0_i32 = arith.constant 0 : i32
    %c0_i32_0 = arith.constant 0 : i32
    %c0_i32_1 = arith.constant 0 : i32
    return %c0_i32, %c0_i32_0 : i32, i32
  }
  func.func @transform_11(%arg0: i32, %arg1: i32) -> (i32, i32) {
    %c0_i32 = arith.constant 0 : i32
    %c0_i32_0 = arith.constant 0 : i32
    %c0_i32_1 = arith.constant 0 : i32
    return %c0_i32, %c0_i32_0 : i32, i32
  }
  func.func @transform_12(%arg0: i32, %arg1: i32) -> (i32, i32) {
    %c0_i32 = arith.constant 0 : i32
    %c0_i32_0 = arith.constant 0 : i32
    %c0_i32_1 = arith.constant 0 : i32
    return %c0_i32, %c0_i32_0 : i32, i32
  }
  func.func @transform_13(%arg0: i32, %arg1: i32) -> (i32, i32, i32) {
    %c0_i32 = arith.constant 0 : i32
    %c0_i32_0 = arith.constant 0 : i32
    return %arg0, %c0_i32, %arg1 : i32, i32, i32
  }
}

</mosaic_0001>

<bundles_post_ra>
// kernel: tpu_custom_call.1
= control target key start
LH: loop header
LB: loop body
LE: loop exit
PB: predicated region body
PF: predicated region fallthrough
CT: control target
= control target key end

     0   :  { %18 = vsyncpa [#allocation3], 0  ;;  %s2752_s0 = inlined_call_operand.vmem [shape: bf16[2,4,16,3], index: 0, kind: input, shape index: {}]   ;;  %s2753_s1 = inlined_call_operand.vmem [shape: bf16[2,16,3], index: 1, kind: input, shape index: {}]   ;;  %s2754_s2 = inlined_call_operand.vmem [shape: bf16[3,128], index: 2, kind: input, shape index: {}]   ;;  %s2755_s3 = inlined_call_operand.vmem [shape: bf16[3,128], index: 3, kind: input, shape index: {}]   ;;  %s2756_s4 = inlined_call_operand.vmem [shape: f32[1,128], index: 4, kind: input, shape index: {}]   ;;  %s2757_s5 = inlined_call_operand.vmem [shape: bf16[128,128], index: 5, kind: input, shape index: {}]   ;;  %s2758_s6 = inlined_call_operand.vmem [shape: f32[1,128], index: 6, kind: input, shape index: {}]   ;;  %s2759_s7 = inlined_call_operand.hbm [shape: bf16[128,128], index: 7, kind: input, shape index: {}]   ;;  %s2760_s8 = inlined_call_operand.vmem [shape: f32[1,128], index: 8, kind: input, shape index: {}]   ;;  %s2761_s9 = inlined_call_operand.hbm [shape: bf16[128,256], index: 9, kind: input, shape index: {}]   ;;  %s2762_s10 = inlined_call_operand.vmem [shape: f32[1,256], index: 10, kind: input, shape index: {}]   ;;  %s2763_s11 = inlined_call_operand.hbm [shape: bf16[640,128], index: 11, kind: input, shape index: {}]   ;;  %s2764_s12 = inlined_call_operand.vmem [shape: f32[1,128], index: 12, kind: input, shape index: {}]   ;;  %s2765_s13 = inlined_call_operand.vmem [shape: f32[2,128,16], index: 13, kind: output, shape index: {}]  }
   0x1   :  { %19 = vsyncpa [#allocation5], 0  ;;  %s2506_s25 = smov 0   ;;  %s2508_s26 = smov 0  }
   0x2   :  { %s2510_s27 = smov 0  }
   0x3 LB: > { %s2425_s28 = smov [#allocation4]   ;;  %s1893_s30 = sadd.s32 4294967295, %s2423_s27   ;;  %s2423_s27 = sphi %s2510_s27, %s25_s27   ;;  %s2419_s26 = sphi %s2508_s26, %s2771_s26   ;;  %s2415_s25 = sphi %s2506_s25, %s2770_s25  }
   0x4   : > { %s400_s29 = sshll.u32 %s2425_s28, 4  ;;  %p1895_p0 = scmp.ge.s32.totalorder %s2423_s27, 1  ;;  %s401_s29 = int_to_ptr.vmem [resolvable:$true] %s400_s29 }
   0x5   : > { %p357_p1 = scmp.lt.s32.totalorder %s2423_s27, 3  ;;  %p2524_p2 = scmp.eq.s32.totalorder %s1893_s30, 0 }
   0x6   : > { %s37_s17 = sadd.s32 1, %s2419_s26  ;;  %s2426_s19 = smov [#allocation2]  }
   0x7   : > { %p2528_p3 = pnand %p1895_p0, %p357_p1  ;;  %p2541_p6 = scmp.ge.s32.totalorder %s37_s17, 2 }
   0x8   : > { %s384_s20 = sshll.u32 %s2426_s19, 4  ;;  %s2326_s21 = scalar_lea.vmem %s401_s29, 2048  ;;  %s385_s20 = int_to_ptr.vmem [resolvable:$true] %s384_s20 }
   0x9   : > { %p2179_p4 = pneg %p2528_p3  ;;  %p2327_p8 = scmp.ne.s32.totalorder %s401_s29, %s2326_s21 }
   0xa   : > { %p2334_p11 = scmp.lt.s32.totalorder %s401_s29, %s401_s29  ;;  %p2335_p12 = scmp.lt.s32.totalorder %s2326_s21, %s2326_s21 }
   0xb   : > { %p2536_p5 = pnand %p2524_p2, %p2179_p4 }
   0xc   : > { %p2336_p13 = por %p2335_p12, %p2334_p11 }
   0xd   : > { %p2317_p7 = pneg %p2536_p5 }
   0xf   : > { %p2329_p9 = pnand %p2327_p8, %p2317_p7 }
  0x11   : > { %p2330_p10 = pneg %p2329_p9 }
  0x13   : > { %p2337_p0 = pnand %p2336_p13, %p2330_p10 }
  0x15   : > { %2340 = shalt.err (!%p2337_p0)
}
  0x16   : > { %s2427_s22 = smov 128   ;;  %s2428_s23 = smov 8  }
  0x17   : > { %2185 = dma.hbm_to_vmem [thread:$0]  (!%p2536_p5), %s2761_s9, 2048, %s401_s29, [#allocation5], %s2427_s22, %s2427_s22, %s2428_s23  }
  0x18   : > { %s2773_s17 = smov (%p2541_p6, %s37_s17), 0  ;;  %s2352_s30 = scalar_lea.vmem %s385_s20, 1024 }
  0x19   : > { %p2353_p1 = scmp.ne.s32.totalorder %s385_s20, %s2352_s30  ;;  %p2360_p9 = scmp.lt.s32.totalorder %s385_s20, %s385_s20 }
  0x1a   : > { %p2361_p10 = scmp.lt.s32.totalorder %s2352_s30, %s2352_s30 }
  0x1b   : > { %p2355_p4 = pnand %p2353_p1, %p2317_p7 }
  0x1c   : > { %p2362_p11 = por %p2361_p10, %p2360_p9 }
  0x1d   : > { %p2356_p8 = pneg %p2355_p4 }
  0x1f   : > { %p2363_p12 = pnand %p2362_p11, %p2356_p8 }
  0x21   : > { %2366 = shalt.err (!%p2363_p12)
}
  0x22   : > { %s2429_s19 = smov 64   ;;  %s2430_s21 = smov 4  }
  0x23   : > { %2182 = dma.hbm_to_vmem [thread:$0]  (!%p2536_p5), %s2759_s7, 1024, %s385_s20, [#allocation3], %s2429_s19, %s2429_s19, %s2430_s21  }
  0x24   : > { %s2431_s22 = smov [#allocation6]  }
  0x25   : > { %s416_s23 = sshll.u32 %s2431_s22, 4  ;;  %s417_s23 = int_to_ptr.vmem [resolvable:$true] %s416_s23 }
  0x26   : > { %s2378_s24 = scalar_lea.vmem %s417_s23, 5120  ;;  %p2386_p1 = scmp.lt.s32.totalorder %s417_s23, %s417_s23 }
  0x27   : > { %p2379_p6 = scmp.ne.s32.totalorder %s417_s23, %s2378_s24  ;;  %p2387_p4 = scmp.lt.s32.totalorder %s2378_s24, %s2378_s24 }
  0x29   : > { %p2381_p13 = pnand %p2379_p6, %p2317_p7  ;;  %p2388_p8 = por %p2387_p4, %p2386_p1 }
  0x2b   : > { %p2382_p0 = pneg %p2381_p13 }
  0x2d   : > { %p2389_p9 = pnand %p2388_p8, %p2382_p0 }
  0x2f   : > { %2392 = shalt.err (!%p2389_p9)
}
  0x30   : > { %2188 = dma.hbm_to_vmem [thread:$0]  (!%p2536_p5), %s2763_s11, 5120, %s417_s23, [#allocation5], %s2429_s19, %s2429_s19, %s2430_s21  }
  0x31   : > { %461 = sbr.rel (%p2528_p3) target bundleno = 1303 (0x517), region = 72 }
  0x36   : > { %2406 = dma.done.wait (%p2524_p2), [#allocation3], 1024  }
  0x37   : > { %2408 = vsyncadd (%p2524_p2), [#allocation3], 4294966272 }
  0x38   : > { %2410 = dma.done.wait (%p2524_p2), [#allocation5], 7168  }
  0x39   : > { %2412 = vsyncadd (%p2524_p2), [#allocation5], 4294960128  ;;  %vm600_vm0 = vcmask 1040384   ;;  %v2432_v0 = vmov 0.0   ;;  %p530_p5 = scmp.lt.s32.totalorder %s2415_s25, 1  ;;  %vm601_vm1 = vcmask 1041408  }
  0x3a   : > { %2093 = vmatprep.subr.bf16.mxu1 %v2432_v0  ;;  %v2433_v1 = vmov 65535   ;;  %vm2434_vm2 = vmmov 0   ;;  %vm587_vm3 = vcmask 23552   ;;  %v566_v4 = vld [vmem:[%s2754_s2] sm:$0x3]  ;;  %v2235_v12 = vld [vmem:[%s2757_s5 + $0x38] sm:$0xff]  }
  0x3b   : > { %v602_v2 = vsel %vm600_vm0, 4294967295, %v2433_v1  ;;  %2095 = vmatprep.mubr.msk.bf16.mxu1 %vm2434_vm2, %v2432_v0  ;;  %s2775_s25 = smov (!%p530_p5, %s2415_s25), 1  ;;  %v674_v5 = vld [vmem:[%s2755_s3] sm:$0x3]  ;;  %v2236_v13 = vld [vmem:[%s2757_s5 + $0x30] sm:$0xff]   ;;  %v2237_v15 = vld [vmem:[%s2757_s5 + $0x28] sm:$0xff]  }
  0x3c   : > { %v603_v3 = vsel %vm601_vm1, %v602_v2, 0  ;;  %s1996_s14 = sshll.u32 %s2775_s25, 5  ;;  %s1997_s22 = sshll.u32 %s2775_s25, 3  ;;  %v2238_v16 = vld [vmem:[%s2757_s5 + $0x20] sm:$0xff]   ;;  %v2239_v17 = vld [vmem:[%s2757_s5 + $0x18] sm:$0xff]   ;;  %v2240_v18 = vld [vmem:[%s2757_s5 + $0x10] sm:$0xff]  }
  0x3d   : > { %s537_s20 = scalar_lea.vmem %s2752_s0, %s1996_s14  ;;  %v605_v6 = vand.u32 %v603_v3, %v566_v4  ;;  %v691_v7 = vand.u32 %v674_v5, %v603_v3  ;;  %s547_s28 = scalar_lea.vmem %s2753_s1, %s1997_s22  ;;  %v2241_v19 = vld [vmem:[%s2757_s5 + $0x8] sm:$0xff]   ;;  %v2242_v20 = vld [vmem:[%s2757_s5] sm:$0xff]   ;;  %v2243_v21 = vld [vmem:[#allocation2 + $0x38] sm:$0xff]   ;;  %v2435_v43 = vmov 0   ;;  %vm1743_vm4 = vcmask 130048  }
  0x3e   : > { %v2230_v8 = vld [vmem:[%s537_s20] sm:$0xff]   ;;  %v2232_v9 = vld [vmem:[%s537_s20 + $0x8] sm:$0xff]   ;;  %v2233_v11 = vld [vmem:[%s537_s20 + $0x10] sm:$0xff]   ;;  %s1998_s30 = sshll.u32 %s2775_s25, 7 }
  0x3f   : > { %2083 = vmatprep.subr.bf16.mxu0 %v605_v6  ;;  %2094 = vmatpush3.bf16.msra.mxu1 %v691_v7  ;;  %v2231_v10 = vld [vmem:[%s547_s28] sm:$0xff]   ;;  %v2234_v14 = vld [vmem:[%s537_s20 + $0x18] sm:$0xff]   ;;  %v2244_v22 = vld [vmem:[#allocation2 + $0x30] sm:$0xff]   ;;  %s2709_s16 = scalar_lea.vmem %s2765_s13, %s1998_s30 }
  0x40   : > { %2084 = vmatpush3.bf16.msra.mxu0 %v605_v6  ;;  %2085 = vmatprep.mubr.msk.bf16.mxu0 %vm587_vm3, %v2230_v8  ;;  %v2245_v23 = vld [vmem:[#allocation2 + $0x28] sm:$0xff]   ;;  %v2246_v24 = vld [vmem:[#allocation2 + $0x20] sm:$0xff]   ;;  %v2247_v25 = vld [vmem:[#allocation2 + $0x18] sm:$0xff]  }
  0x41   : > { %2099 = vmatprep.subr.bf16.mxu0 %v2235_v12  ;;  %2123 = vmatprep.subr.bf16.mxu1 %v2243_v21  ;;  %v1918_v28 = vld [vmem:[%s2756_s4] ss:$0 sm:$0xff]  ;;  %v2248_v58 = vld [vmem:[#allocation2 + $0x10] sm:$0xff]   ;;  %v2249_v59 = vld [vmem:[#allocation2 + $0x8] sm:$0xff]  }
  0x42   : > { %2096 = vmatmul.mubr.msk.bf16.vlgmr.msra.gmra.mxu1 %vm587_vm3, %v2231_v10  ;;  %v2250_v60 = vld [vmem:[#allocation2] sm:$0xff]   ;;  %v2251_v61 = vld [vmem:[#allocation6 + $0x78] sm:$0xff]  }
  0x43   : > { %2086 = vmatmul.mubr.msk.bf16.vlgmr.msra.gmra.mxu0 %vm587_vm3, %v2232_v9  ;;  %2124 = vmatpush3.bf16.msra.mxu1 %v2243_v21  ;;  %v2267_v62 = vld [vmem:[#allocation4 + $0x70] ss:$8 sps:$4 sm:$0xff]   ;;  %v2269_v63 = vld [vmem:[#allocation4 + $0x74] ss:$8 sps:$4 sm:$0xff]   ;;  %v2272_v1 = vld [vmem:[#allocation4 + $0x64] ss:$8 sps:$4 sm:$0xff]   ;;  %v888_v9 = vlaneseq }
  0x44   : > { %2089 = vmatprep.mubr.msk.bf16.mxu0 %vm587_vm3, %v2233_v11  ;;  %2100 = vmatpush3.bf16.msra.mxu0 %v2235_v12  ;;  %v2270_v2 = vld [vmem:[#allocation4 + $0x60] ss:$8 sps:$4 sm:$0xff]   ;;  %v2275_v3 = vld [vmem:[#allocation4 + $0x54] ss:$8 sps:$4 sm:$0xff]   ;;  %v2273_v4 = vld [vmem:[#allocation4 + $0x50] ss:$8 sps:$4 sm:$0xff]  }
  0x45   : > { %2101 = vmatprep.subr.bf16.mxu0 %v2236_v13  ;;  %2125 = vmatprep.subr.bf16.mxu1 %v2244_v22  ;;  %v2278_v5 = vld [vmem:[#allocation4 + $0x44] ss:$8 sps:$4 sm:$0xff]   ;;  %v2276_v6 = vld [vmem:[#allocation4 + $0x40] ss:$8 sps:$4 sm:$0xff]   ;;  %v2281_v7 = vld [vmem:[#allocation4 + $0x34] ss:$8 sps:$4 sm:$0xff]  }
  0x46   : > { %v2279_v8 = vld [vmem:[#allocation4 + $0x30] ss:$8 sps:$4 sm:$0xff]   ;;  %v883_v10 = vld [vmem:[%s2758_s6] sm:$0x1]  ;;  %v2653_v12 = vshrl.u32 %v888_v9, 7 }
  0x47   : > { %2126 = vmatpush3.bf16.msra.mxu1 %v2244_v22  ;;  %v884_v11 = vpack.c.bf16 %v883_v10, %v883_v10 }
  0x48   : > { %2102 = vmatpush3.bf16.msra.mxu0 %v2236_v13  ;;  %2127 = vmatprep.subr.bf16.mxu1 %v2245_v23 }
  0x49   : > { %2103 = vmatprep.subr.bf16.mxu0 %v2237_v15 }
  0x4b   : > { %2090 = vmatmul.mubr.msk.bf16.gmra.mxu0 %vm587_vm3, %v2234_v14  ;;  %2128 = vmatpush3.bf16.msra.mxu1 %v2245_v23  ;;  %v886_v14 = vpack.i.b16 %v884_v11, %v884_v11 }
  0x4c   : > { %2104 = vmatpush3.bf16.msra.mxu0 %v2237_v15  ;;  %2129 = vmatprep.subr.bf16.mxu1 %v2246_v24  ;;  %v2656_v15 = vsub.s32 0, %v2653_v12 }
  0x4d   : > { %2105 = vmatprep.subr.bf16.mxu0 %v2238_v16 }
  0x4f   : > { %2130 = vmatpush3.bf16.msra.mxu1 %v2246_v24 }
  0x50   : > { %2106 = vmatpush3.bf16.msra.mxu0 %v2238_v16  ;;  %2131 = vmatprep.subr.bf16.mxu1 %v2247_v25 }
  0x51   : > { %2107 = vmatprep.subr.bf16.mxu0 %v2239_v17 }
  0x53   : > { %2132 = vmatpush3.bf16.msra.mxu1 %v2247_v25 }
  0x54   : > { %2108 = vmatpush3.bf16.msra.mxu0 %v2239_v17  ;;  %2133 = vmatprep.subr.bf16.mxu1 %v2248_v58 }
  0x55   : > { %2109 = vmatprep.subr.bf16.mxu0 %v2240_v18 }
  0x57   : > { %2134 = vmatpush3.bf16.msra.mxu1 %v2248_v58  ;;  %v2282_v58 = vld [vmem:[#allocation4 + $0x20] ss:$8 sps:$4 sm:$0xff]  }
  0x58   : > { %2110 = vmatpush3.bf16.msra.mxu0 %v2240_v18  ;;  %2135 = vmatprep.subr.bf16.mxu1 %v2249_v59  ;;  %v891_v18 = vrot.slane %v886_v14, %v2656_v15 }
  0x59   : > { %2111 = vmatprep.subr.bf16.mxu0 %v2241_v19 }
  0x5b   : > { %2136 = vmatpush3.bf16.msra.mxu1 %v2249_v59  ;;  %v2284_v59 = vld [vmem:[#allocation4 + $0x24] ss:$8 sps:$4 sm:$0xff]  }
  0x5c   : > { %2112 = vmatpush3.bf16.msra.mxu0 %v2241_v19  ;;  %2137 = vmatprep.subr.bf16.mxu1 %v2250_v60 }
  0x5d   : > { %2113 = vmatprep.subr.bf16.mxu0 %v2242_v20 }
  0x5f   : > { %2138 = vmatpush3.bf16.msra.mxu1 %v2250_v60  ;;  %v2287_v60 = vld [vmem:[#allocation4 + $0x14] ss:$8 sps:$4 sm:$0xff]  }
  0x60   : > { %2114 = vmatpush3.bf16.msra.mxu0 %v2242_v20  ;;  %2030 = vmatprep.subr.bf16.mxu1 %v2251_v61  ;;  %v2285_v61 = vld [vmem:[#allocation4 + $0x10] ss:$8 sps:$4 sm:$0xff]  }
  0x61   : > { %1152 = vmatprep.subr.bf16.mxu0 %v2269_v63  ;;  %v2288_v63 = vld [vmem:[#allocation4] ss:$8 sps:$4 sm:$0xff]  }
 0x102   : > { %v727_v26 = vpop.f32.mrf.mxu1 }
 0x103   : > { %v2087_v27 = vpop.f32.mrf.mxu0  ;;  %v728_v32 = vadd.f32 %v1918_v28, %v727_v26 }
 0x104   : > { %v2097_v29 = vpop.f32.mrf.mxu1 }
 0x105   : > { %v641_v30 = vpop.f32.mrf.mxu0 }
 0x106   : > { %v730_v31 = vpop.f32.mrf.mxu1 }
 0x107   : > { %v731_v33 = vadd.f32 %v1918_v28, %v730_v31  ;;  %v2088_v34 = vpop.f32.mrf.mxu0 }
 0x108   : > { %v736_v35 = vpack.c.bf16 %v2088_v34, %v2087_v27  ;;  %v2098_v36 = vpop.f32.mrf.mxu1  ;;  %v2252_v27 = vld [vmem:[#allocation6 + $0x38] sm:$0xff]   ;;  %v2254_v34 = vld [vmem:[#allocation6 + $0x30] sm:$0xff]  }
 0x109   : > { %v734_v37 = vpack.c.bf16 %v731_v33, %v728_v32  ;;  %v644_v38 = vpop.f32.mrf.mxu0  ;;  %v2255_v36 = vld [vmem:[#allocation6 + $0x68] sm:$0xff]  }
 0x10a   : > { %v735_v39 = vpack.c.bf16 %v644_v38, %v641_v30  ;;  %v2253_v30 = vld [vmem:[#allocation6 + $0x70] sm:$0xff]  }
 0x10b   : > { %v740_v40 = vadd.bf16 %v736_v35, %v734_v37  ;;  %v2091_v41 = vpop.f32.mrf.mxu0 }
 0x10c   : > { %v739_v42 = vadd.bf16 %v735_v39, %v734_v37 }
 0x10d   : > { %v744_v44 = vmax.bf16 %v2435_v43, %v740_v40  ;;  %v657_v45 = vpop.f32.mrf.mxu0  ;;  %v2256_v40 = vld [vmem:[#allocation6 + $0x28] sm:$0xff]  }
 0x10e   : > { %v743_v46 = vmax.bf16 %v2435_v43, %v739_v42  ;;  %v2257_v42 = vld [vmem:[#allocation6 + $0x60] sm:$0xff]  }
 0x10f   : > { %v2092_v47 = vpop.f32.mrf.mxu0 }
 0x110   : > { %v738_v48 = vpack.c.bf16 %v2092_v47, %v2091_v41  ;;  %v747_v49 = vmax.bf16 %v744_v44, %v743_v46  ;;  %2115 = vmatprep.mubr.bf16.mxu0 %v743_v46  ;;  %v2258_v46 = vld [vmem:[#allocation6 + $0x20] sm:$0xff]   ;;  %v2259_v47 = vld [vmem:[#allocation6 + $0x58] sm:$0xff]  }
 0x111   : > { %v660_v50 = vpop.f32.mrf.mxu0  ;;  %2116 = vmatmul.mubr.bf16.vlgmr.msra.gmra.mxu0 %v744_v44 }
 0x112   : > { %v737_v51 = vpack.c.bf16 %v660_v50, %v657_v45  ;;  %v742_v52 = vadd.bf16 %v738_v48, %v734_v37  ;;  %1153 = vmatpush1.bf16.msra.mxu0 %v2267_v62  ;;  %v2260_v48 = vld [vmem:[#allocation6 + $0x18] sm:$0xff]   ;;  %v2262_v50 = vld [vmem:[#allocation6 + $0x10] sm:$0xff]   ;;  %v2290_v62 = vld [vmem:[#allocation4 + $0x4] ss:$8 sps:$4 sm:$0xff]  }
 0x113   : > { %1154 = vmatprep.subr.bf16.mxu0 %v2272_v1 }
 0x114   : > { %v741_v53 = vadd.bf16 %v737_v51, %v734_v37  ;;  %v2642_v55 = vmax.bf16 %v2435_v43, %v742_v52  ;;  %v2263_v51 = vld [vmem:[#allocation6 + $0x48] sm:$0xff]  }
 0x115   : > { %v2264_v52 = vld [vmem:[#allocation6 + $0x8] sm:$0xff]  }
 0x116   : > { %v745_v54 = vmax.bf16 %v2435_v43, %v741_v53  ;;  %1155 = vmatpush1.bf16.msra.mxu0 %v2270_v2  ;;  %v2265_v53 = vld [vmem:[#allocation6 + $0x40] sm:$0xff]  }
 0x117   : > { %1156 = vmatprep.subr.bf16.mxu0 %v2275_v3 }
 0x118   : > { %v2644_v56 = vmax.bf16 %v747_v49, %v745_v54  ;;  %2119 = vmatprep.mubr.bf16.mxu0 %v745_v54  ;;  %v2261_v49 = vld [vmem:[#allocation6 + $0x50] sm:$0xff]   ;;  %v2266_v54 = vld [vmem:[#allocation6] sm:$0xff]  }
 0x119   : > { %2120 = vmatmul.mubr.bf16.gmra.mxu0 %v2642_v55 }
 0x11a   : > { %v749_v57 = vmax.bf16 %v2644_v56, %v2642_v55  ;;  %1184 = vmatprep.mubr.bf16.mxu0 %v2435_v43  ;;  %1157 = vmatpush1.bf16.msra.mxu0 %v2273_v4  ;;  %v1036_v55 = vld [vmem:[%s2760_s8] sm:$0x1] }
 0x11b   : > { %1158 = vmatprep.subr.bf16.mxu0 %v2278_v5  ;;  %v1037_v56 = vpack.c.bf16 %v1036_v55, %v1036_v55 }
 0x11e   : > { %1159 = vmatpush1.bf16.msra.mxu0 %v2276_v6 }
 0x11f   : > { %1160 = vmatprep.subr.bf16.mxu0 %v2281_v7 }
 0x122   : > { %1161 = vmatpush1.bf16.msra.mxu0 %v2279_v8 }
 0x123   : > { %1162 = vmatprep.subr.bf16.mxu0 %v2284_v59 }
 0x126   : > { %1163 = vmatpush1.bf16.msra.mxu0 %v2282_v58 }
 0x127   : > { %1164 = vmatprep.subr.bf16.mxu0 %v2287_v60 }
 0x12a   : > { %1165 = vmatpush1.bf16.msra.mxu0 %v2285_v61 }
 0x12b   : > { %1166 = vmatprep.subr.bf16.mxu0 %v2290_v62 }
 0x12e   : > { %1167 = vmatpush1.bf16.msra.mxu0 %v2288_v63 }
 0x1d1   : > { %v2117_v13 = vpop.f32.mrf.mxu0 }
 0x1d3   : > { %v848_v16 = vpop.f32.mrf.mxu0 }
 0x1d5   : > { %v2118_v17 = vpop.f32.mrf.mxu0 }
 0x1d6   : > { %v880_v19 = vpack.c.bf16 %v2118_v17, %v2117_v13 }
 0x1d7   : > { %v851_v20 = vpop.f32.mrf.mxu0 }
 0x1d8   : > { %v879_v21 = vpack.c.bf16 %v851_v20, %v848_v16  ;;  %v893_v22 = vadd.bf16 %v891_v18, %v880_v19 }
 0x1d9   : > { %v2121_v23 = vpop.f32.mrf.mxu0 }
 0x1da   : > { %v892_v24 = vadd.bf16 %v891_v18, %v879_v21  ;;  %v897_v28 = vmax.bf16 %v2435_v43, %v893_v22 }
 0x1db   : > { %v864_v25 = vpop.f32.mrf.mxu0 }
 0x1dc   : > { %v896_v26 = vmax.bf16 %v2435_v43, %v892_v24 }
 0x1dd   : > { %v2122_v29 = vpop.f32.mrf.mxu0 }
 0x1de   : > { %v882_v31 = vpack.c.bf16 %v2122_v29, %v2121_v23  ;;  %2139 = vmatprep.mubr.bf16.mxu1 %v896_v26  ;;  %v900_v38 = vmax.bf16 %v897_v28, %v896_v26  ;;  %v2293_v29 = vld [vmem:[#allocation6 + $0x138] sm:$0xff]  }
 0x1df   : > { %v867_v32 = vpop.f32.mrf.mxu0  ;;  %2140 = vmatmul.mubr.bf16.vlgmr.msra.gmra.mxu1 %v897_v28  ;;  %v2292_v28 = vld [vmem:[#allocation6 + $0xb8] sm:$0xff]  }
 0x1e0   : > { %v881_v33 = vpack.c.bf16 %v867_v32, %v864_v25  ;;  %2031 = vmatpush3.bf16.msra.mxu1 %v2252_v27  ;;  %v895_v35 = vadd.bf16 %v891_v18, %v882_v31  ;;  %v2291_v27 = vld [vmem:[#allocation6 + $0xf8] sm:$0xff]   ;;  %v2295_v31 = vld [vmem:[#allocation6 + $0xb0] sm:$0xff]  }
 0x1e1   : > { %2032 = vmatprep.subr.bf16.mxu1 %v2253_v30  ;;  %2052 = vmatprep.subr.bf16.mxu0 %v2291_v27  ;;  %v2294_v30 = vld [vmem:[#allocation6 + $0xf0] sm:$0xff]  }
 0x1e2   : > { %v894_v37 = vadd.bf16 %v891_v18, %v881_v33  ;;  %v899_v41 = vmax.bf16 %v2435_v43, %v895_v35  ;;  %v2296_v32 = vld [vmem:[#allocation6 + $0x130] sm:$0xff]   ;;  %v2297_v33 = vld [vmem:[#allocation6 + $0xe8] sm:$0xff]   ;;  %v2300_v35 = vld [vmem:[#allocation6 + $0xe0] sm:$0xff]  }
 0x1e4   : > { %2033 = vmatpush3.bf16.msra.mxu1 %v2254_v34  ;;  %v898_v39 = vmax.bf16 %v2435_v43, %v894_v37  ;;  %v2298_v34 = vld [vmem:[#allocation6 + $0xa8] sm:$0xff]   ;;  %v2302_v37 = vld [vmem:[#allocation6 + $0x120] sm:$0xff]  }
 0x1e5   : > { %2034 = vmatprep.subr.bf16.mxu1 %v2255_v36  ;;  %v2301_v36 = vld [vmem:[#allocation6 + $0xa0] sm:$0xff]  }
 0x1e6   : > { %2143 = vmatprep.mubr.bf16.mxu1 %v898_v39  ;;  %v901_v44 = vmax.bf16 %v900_v38, %v898_v39  ;;  %v2303_v38 = vld [vmem:[#allocation6 + $0xd8] sm:$0xff]  }
 0x1e7   : > { %2144 = vmatmul.mubr.bf16.gmra.mxu1 %v899_v41  ;;  %v2304_v39 = vld [vmem:[#allocation6 + $0x98] sm:$0xff]  }
 0x1e8   : > { %2035 = vmatpush3.bf16.msra.mxu1 %v2256_v40  ;;  %v902_v45 = vmax.bf16 %v901_v44, %v899_v41  ;;  %v2305_v40 = vld [vmem:[#allocation6 + $0x118] sm:$0xff]   ;;  %v2306_v41 = vld [vmem:[#allocation6 + $0xd0] sm:$0xff]  }
 0x1e9   : > { %2036 = vmatprep.subr.bf16.mxu1 %v2257_v42  ;;  %v2307_v42 = vld [vmem:[#allocation6 + $0x90] sm:$0xff]  }
 0x1ea   : > { %1618 = vmatprep.mubr.bf16.mxu1 %v902_v45  ;;  %v2308_v44 = vld [vmem:[#allocation6 + $0x110] sm:$0xff]   ;;  %v2309_v45 = vld [vmem:[#allocation6 + $0xc8] sm:$0xff]  }
 0x1ec   : > { %2037 = vmatpush3.bf16.msra.mxu1 %v2258_v46  ;;  %v2310_v46 = vld [vmem:[#allocation6 + $0x88] sm:$0xff]  }
 0x1ed   : > { %2038 = vmatprep.subr.bf16.mxu1 %v2259_v47  ;;  %v2311_v47 = vld [vmem:[#allocation6 + $0x108] sm:$0xff]  }
 0x1f0   : > { %2039 = vmatpush3.bf16.msra.mxu1 %v2260_v48  ;;  %v2312_v48 = vld [vmem:[#allocation6 + $0xc0] sm:$0xff]  }
 0x1f1   : > { %2040 = vmatprep.subr.bf16.mxu1 %v2261_v49  ;;  %v2313_v49 = vld [vmem:[#allocation6 + $0x80] sm:$0xff]  }
 0x1f4   : > { %2041 = vmatpush3.bf16.msra.mxu1 %v2262_v50  ;;  %v2314_v50 = vld [vmem:[#allocation6 + $0x100] sm:$0xff]  }
 0x1f5   : > { %2042 = vmatprep.subr.bf16.mxu1 %v2263_v51 }
 0x1f8   : > { %2043 = vmatpush3.bf16.msra.mxu1 %v2264_v52 }
 0x1f9   : > { %2044 = vmatprep.subr.bf16.mxu1 %v2265_v53 }
 0x1fc   : > { %2045 = vmatpush3.bf16.msra.mxu1 %v2266_v54 }
 0x1fd   : > { %2147 = vmatprep.subr.bf16.mxu1 %v2432_v0 }
 0x1ff   : > { %1619 = vmatmul.mubr.bf16.vlgmr.msra.gmra.mxu1 %v749_v57  ;;  %v1039_v57 = vpack.i.b16 %v1037_v56, %v1037_v56 }
 0x200   : > { %2163 = vmatprep.mubr.msk.bf16.mxu1 %vm2434_vm2, %v2432_v0  ;;  %2148 = vmatpush3.bf16.msra.mxu1 %v2293_v29 }
 0x201   : > { %v1044_v3 = vrot.slane %v1039_v57, %v2656_v15  ;;  %2149 = vmatprep.subr.bf16.mxu1 %v2432_v0 }
 0x204   : > { %2150 = vmatpush3.bf16.msra.mxu1 %v2296_v32 }
 0x205   : > { %2151 = vmatprep.subr.bf16.mxu1 %v2432_v0 }
 0x29f   : > { %v2141_v1 = vpop.f32.mrf.mxu1 }
 0x2a1   : > { %v1001_v2 = vpop.f32.mrf.mxu1 }
 0x2a3   : > { %v2142_v4 = vpop.f32.mrf.mxu1 }
 0x2a4   : > { %v1033_v5 = vpack.c.bf16 %v2142_v4, %v2141_v1 }
 0x2a5   : > { %v1004_v6 = vpop.f32.mrf.mxu1 }
 0x2a6   : > { %v1046_v7 = vadd.bf16 %v1044_v3, %v1033_v5  ;;  %v1032_v8 = vpack.c.bf16 %v1004_v6, %v1001_v2 }
 0x2a7   : > { %v2145_v9 = vpop.f32.mrf.mxu1 }
 0x2a8   : > { %v1045_v10 = vadd.bf16 %v1044_v3, %v1032_v8  ;;  %v1050_v14 = vmax.bf16 %v2435_v43, %v1046_v7 }
 0x2a9   : > { %v1017_v11 = vpop.f32.mrf.mxu1 }
 0x2aa   : > { %v1049_v13 = vmax.bf16 %v2435_v43, %v1045_v10 }
 0x2ab   : > { %v2146_v16 = vpop.f32.mrf.mxu1 }
 0x2ac   : > { %v1035_v17 = vpack.c.bf16 %v2146_v16, %v2145_v9  ;;  %1185 = vmatmul.mubr.bf16.vlgmr.msra.gmra.mxu0 %v1049_v13  ;;  %v1053_v18 = vmax.bf16 %v1050_v14, %v1049_v13 }
 0x2ad   : > { %v1020_v19 = vpop.f32.mrf.mxu1  ;;  %1194 = vmatprep.mubr.bf16.mxu0 %v2435_v43  ;;  %2053 = vmatpush3.bf16.msra.mxu0 %v2292_v28 }
 0x2ae   : > { %v1034_v20 = vpack.c.bf16 %v1020_v19, %v1017_v11  ;;  %v1048_v21 = vadd.bf16 %v1044_v3, %v1035_v17  ;;  %2054 = vmatprep.subr.bf16.mxu0 %v2294_v30 }
 0x2b0   : > { %v1047_v22 = vadd.bf16 %v1044_v3, %v1034_v20  ;;  %v2680_v25 = vmax.bf16 %v2435_v43, %v1048_v21  ;;  %v1245_v3 = vsub.s32 1, %v2653_v12 }
 0x2b1   : > { %2055 = vmatpush3.bf16.msra.mxu0 %v2295_v31 }
 0x2b2   : > { %v1051_v23 = vmax.bf16 %v2435_v43, %v1047_v22  ;;  %2056 = vmatprep.subr.bf16.mxu0 %v2297_v33 }
 0x2b4   : > { %1195 = vmatmul.mubr.bf16.gmra.mxu0 %v1050_v14  ;;  %v2677_v24 = vmax.bf16 %v1053_v18, %v1051_v23 }
 0x2b5   : > { %1204 = vmatprep.mubr.bf16.mxu0 %v2435_v43  ;;  %2057 = vmatpush3.bf16.msra.mxu0 %v2298_v34 }
 0x2b6   : > { %v1055_v26 = vmax.bf16 %v2677_v24, %v2680_v25  ;;  %2058 = vmatprep.subr.bf16.mxu0 %v2300_v35 }
 0x2b9   : > { %2059 = vmatpush3.bf16.msra.mxu0 %v2301_v36  ;;  %v1953_v36 = vld [vmem:[%s2764_s12] ss:$0 sm:$0xff] }
 0x2ba   : > { %2060 = vmatprep.subr.bf16.mxu0 %v2303_v38 }
 0x2bc   : > { %1205 = vmatmul.mubr.bf16.gmra.mxu0 %v1051_v23 }
 0x2bd   : > { %1214 = vmatprep.mubr.bf16.mxu0 %v2435_v43  ;;  %v2299_v43 = vld [vmem:[#allocation6 + $0x128] sm:$0xff]   ;;  %2061 = vmatpush3.bf16.msra.mxu0 %v2304_v39 }
 0x2be   : > { %2152 = vmatpush3.bf16.msra.mxu1 %v2299_v43  ;;  %2062 = vmatprep.subr.bf16.mxu0 %v2306_v41 }
 0x2bf   : > { %2153 = vmatprep.subr.bf16.mxu1 %v2432_v0  ;;  %v2046_v32 = vpop.f32.mrf.mxu1 }
 0x2c1   : > { %2063 = vmatpush3.bf16.msra.mxu0 %v2307_v42  ;;  %v2047_v33 = vpop.f32.mrf.mxu1 }
 0x2c2   : > { %2154 = vmatpush3.bf16.msra.mxu1 %v2302_v37  ;;  %2064 = vmatprep.subr.bf16.mxu0 %v2309_v45  ;;  %v2048_v43 = vadd.f32 %v2047_v33, %v2046_v32 }
 0x2c3   : > { %2155 = vmatprep.subr.bf16.mxu1 %v2432_v0  ;;  %v2049_v34 = vpop.f32.mrf.mxu1 }
 0x2c4   : > { %1215 = vmatmul.mubr.bf16.gmra.mxu0 %v2680_v25 }
 0x2c5   : > { %2065 = vmatpush3.bf16.msra.mxu0 %v2310_v46  ;;  %v2050_v35 = vpop.f32.mrf.mxu1 }
 0x2c6   : > { %2156 = vmatpush3.bf16.msra.mxu1 %v2305_v40  ;;  %2066 = vmatprep.subr.bf16.mxu0 %v2312_v48  ;;  %v1621_v40 = vadd.f32 %v2048_v43, %v1953_v36  ;;  %v2051_v41 = vadd.f32 %v2050_v35, %v2049_v34 }
 0x2c7   : > { %2157 = vmatprep.subr.bf16.mxu1 %v2432_v0 }
 0x2c8   : > { %v1624_v46 = vadd.f32 %v2051_v41, %v1953_v36 }
 0x2c9   : > { %2067 = vmatpush3.bf16.msra.mxu0 %v2313_v49 }
 0x2ca   : > { %2158 = vmatpush3.bf16.msra.mxu1 %v2308_v44 }
 0x2cb   : > { %2159 = vmatprep.subr.bf16.mxu1 %v2432_v0 }
 0x2ce   : > { %2160 = vmatpush3.bf16.msra.mxu1 %v2311_v47 }
 0x2cf   : > { %2161 = vmatprep.subr.bf16.mxu1 %v2432_v0  ;;  %v1237_v0 = vld [vmem:[%s2762_s10] sm:$0x3] }
 0x2d0   : > { %v1242_v8 = vrot.slane %v1237_v0, %v2656_v15  ;;  %v1246_v14 = vrot.slane %v1237_v0, %v1245_v3 }
 0x2d2   : > { %2162 = vmatpush3.bf16.msra.mxu1 %v2314_v50 }
 0x36c   : > { %v1186_v51 = vpop.f32.mrf.mxu0 }
 0x36e   : > { %v1188_v52 = vpop.f32.mrf.mxu0 }
 0x370   : > { %v1190_v53 = vpop.f32.mrf.mxu0 }
 0x372   : > { %v1192_v54 = vpop.f32.mrf.mxu0 }
 0x374   : > { %v1196_v58 = vpop.f32.mrf.mxu0 }
 0x375   : > { %v1225_v56 = vmax.f32 %v1186_v51, %v1196_v58 }
 0x376   : > { %v1198_v59 = vpop.f32.mrf.mxu0 }
 0x377   : > { %v1226_v1 = vmax.f32 %v1188_v52, %v1198_v59 }
 0x378   : > { %v1200_v60 = vpop.f32.mrf.mxu0 }
 0x379   : > { %v1227_v5 = vmax.f32 %v1190_v53, %v1200_v60 }
 0x37a   : > { %v1202_v61 = vpop.f32.mrf.mxu0 }
 0x37b   : > { %v1228_v10 = vmax.f32 %v1192_v54, %v1202_v61 }
 0x37c   : > { %v1206_v62 = vpop.f32.mrf.mxu0 }
 0x37d   : > { %v1229_v2 = vmax.f32 %v1225_v56, %v1206_v62 }
 0x37e   : > { %v1208_v63 = vpop.f32.mrf.mxu0 }
 0x37f   : > { %v1230_v6 = vmax.f32 %v1226_v1, %v1208_v63 }
 0x380   : > { %v1210_v55 = vpop.f32.mrf.mxu0 }
 0x381   : > { %v1231_v11 = vmax.f32 %v1227_v5, %v1210_v55 }
 0x382   : > { %v1212_v57 = vpop.f32.mrf.mxu0 }
 0x383   : > { %v1232_v17 = vmax.f32 %v1228_v10, %v1212_v57 }
 0x384   : > { %v1216_v4 = vpop.f32.mrf.mxu0 }
 0x385   : > { %v1233_v7 = vmax.f32 %v1229_v2, %v1216_v4 }
 0x386   : > { %v1218_v9 = vpop.f32.mrf.mxu0 }
 0x387   : > { %v1234_v13 = vmax.f32 %v1230_v6, %v1218_v9  ;;  %v1249_v18 = vadd.f32 %v1242_v8, %v1233_v7 }
 0x388   : > { %v1220_v16 = vpop.f32.mrf.mxu0 }
 0x389   : > { %v1235_v19 = vmax.f32 %v1231_v11, %v1220_v16  ;;  %v1250_v21 = vadd.f32 %v1246_v14, %v1234_v13  ;;  %v1253_v12 = vmax.f32 %v1249_v18, 0.0 }
 0x38a   : > { %v1222_v20 = vpop.f32.mrf.mxu0 }
 0x38b   : > { %v1251_v22 = vadd.f32 %v1242_v8, %v1235_v19  ;;  %v1236_v23 = vmax.f32 %v1232_v17, %v1222_v20  ;;  %v1254_v29 = vmax.f32 %v1250_v21, 0.0 }
 0x38d   : > { %v1255_v27 = vmax.f32 %v1251_v22, 0.0  ;;  %v1252_v28 = vadd.f32 %v1246_v14, %v1236_v23 }
 0x38f   : > { %v1256_v30 = vmax.f32 %v1252_v28, 0.0  ;;  %v1257_v31 = vpack.c.bf16 %v1255_v27, %v1253_v12 }
 0x391   : > { %v1258_v15 = vpack.c.bf16 %v1256_v30, %v1254_v29  ;;  %1659 = vmatprep.mubr.bf16.mxu0 %v1257_v31 }
 0x392   : > { %1660 = vmatmul.mubr.bf16.vlgmr.msra.gmra.mxu0 %v1055_v26 }
 0x393   : > { %2164 = vmatmul.mubr.bf16.vlgmr.msra.gmra.mxu1 %v1258_v15 }
 0x452   : > { %v2068_v37 = vpop.f32.mrf.mxu0 }
 0x453   : > { %v1702_v38 = vpop.f32.mrf.mxu1 }
 0x454   : > { %v2069_v39 = vpop.f32.mrf.mxu0 }
 0x455   : > { %v2070_v42 = vadd.f32 %v2069_v39, %v2068_v37  ;;  %v2165_v44 = vpop.f32.mrf.mxu1 }
 0x456   : > { %v2071_v24 = vpop.f32.mrf.mxu0 }
 0x457   : > { %v1705_v25 = vpop.f32.mrf.mxu1  ;;  %v1662_v26 = vadd.f32 %v2070_v42, %v1621_v40 }
 0x458   : > { %v2072_v45 = vpop.f32.mrf.mxu0 }
 0x459   : > { %v2073_v47 = vadd.f32 %v2072_v45, %v2071_v24  ;;  %v2166_v48 = vpop.f32.mrf.mxu1  ;;  %v1703_v49 = vadd.f32 %v1702_v38, %v1662_v26 }
 0x45b   : > { %v1665_v50 = vadd.f32 %v2073_v47, %v1624_v46  ;;  %v1709_v51 = vmax.f32 %v1703_v49, 0.0 }
 0x45d   : > { %1711 = vxpose.xlu0.b32.start [1/2] (short) %v1709_v51, 128  ;;  %v1706_v52 = vadd.f32 %v1705_v25, %v1665_v50 }
 0x45f   : > { %v1710_v53 = vmax.f32 %v1706_v52, 0.0 }
 0x461   : > { %1712 = vxpose.xlu0.b32.end [2/2] (short) %v1710_v53, 128 }
 0x4d9   : > { %v1727_v54 = vpop.trf.xlu0 }
 0x4da   : > { %1744 = vst.msk [vmem:[%s2709_s16] sm:$0xff] %vm1743_vm4, %v1727_v54 }
 0x4dd   : > { %v1728_v58 = vpop.trf.xlu0 }
 0x4de   : > { %1745 = vst.msk [vmem:[%s2709_s16 + $0x8] sm:$0xff] %vm1743_vm4, %v1728_v58 }
 0x4e1   : > { %v1729_v59 = vpop.trf.xlu0 }
 0x4e2   : > { %1746 = vst.msk [vmem:[%s2709_s16 + $0x10] sm:$0xff] %vm1743_vm4, %v1729_v59 }
 0x4e5   : > { %v1730_v60 = vpop.trf.xlu0 }
 0x4e6   : > { %1747 = vst.msk [vmem:[%s2709_s16 + $0x18] sm:$0xff] %vm1743_vm4, %v1730_v60 }
 0x4e9   : > { %v1731_v61 = vpop.trf.xlu0 }
 0x4ea   : > { %1748 = vst.msk [vmem:[%s2709_s16 + $0x20] sm:$0xff] %vm1743_vm4, %v1731_v61 }
 0x4ed   : > { %v1732_v62 = vpop.trf.xlu0 }
 0x4ee   : > { %1749 = vst.msk [vmem:[%s2709_s16 + $0x28] sm:$0xff] %vm1743_vm4, %v1732_v62 }
 0x4f1   : > { %v1733_v63 = vpop.trf.xlu0 }
 0x4f2   : > { %1750 = vst.msk [vmem:[%s2709_s16 + $0x30] sm:$0xff] %vm1743_vm4, %v1733_v63 }
 0x4f5   : > { %v1734_v55 = vpop.trf.xlu0 }
 0x4f6   : > { %1751 = vst.msk [vmem:[%s2709_s16 + $0x38] sm:$0xff] %vm1743_vm4, %v1734_v55 }
 0x4f9   : > { %v1735_v56 = vpop.trf.xlu0 }
 0x4fa   : > { %1752 = vst.msk [vmem:[%s2709_s16 + $0x40] sm:$0xff] %vm1743_vm4, %v1735_v56 }
 0x4fd   : > { %v1736_v57 = vpop.trf.xlu0 }
 0x4fe   : > { %1753 = vst.msk [vmem:[%s2709_s16 + $0x48] sm:$0xff] %vm1743_vm4, %v1736_v57 }
 0x501   : > { %v1737_v0 = vpop.trf.xlu0 }
 0x502   : > { %1754 = vst.msk [vmem:[%s2709_s16 + $0x50] sm:$0xff] %vm1743_vm4, %v1737_v0 }
 0x505   : > { %v1738_v1 = vpop.trf.xlu0 }
 0x506   : > { %1755 = vst.msk [vmem:[%s2709_s16 + $0x58] sm:$0xff] %vm1743_vm4, %v1738_v1 }
 0x509   : > { %v1739_v2 = vpop.trf.xlu0 }
 0x50a   : > { %1756 = vst.msk [vmem:[%s2709_s16 + $0x60] sm:$0xff] %vm1743_vm4, %v1739_v2 }
 0x50d   : > { %v1740_v3 = vpop.trf.xlu0 }
 0x50e   : > { %1757 = vst.msk [vmem:[%s2709_s16 + $0x68] sm:$0xff] %vm1743_vm4, %v1740_v3 }
 0x511   : > { %v1741_v4 = vpop.trf.xlu0 }
 0x512   : > { %1758 = vst.msk [vmem:[%s2709_s16 + $0x70] sm:$0xff] %vm1743_vm4, %v1741_v4 }
 0x515   : > { %v1742_v5 = vpop.trf.xlu0 }
 0x516   : > { %1759 = vst.msk [vmem:[%s2709_s16 + $0x78] sm:$0xff] %vm1743_vm4, %v1742_v5 }
 0x517 PF: > { %s25_s27 = sadd.s32 1, %s2423_s27   ;;  %s2770_s25 = smov %s2419_s26 }
 0x518   : > { %p22_p2 = scmp.ge.s32.totalorder %s25_s27, 4   ;;  %s2771_s26 = smov %s2773_s17 }
 0x51a   :  { %24 = sbr.rel (!%p22_p2) target bundleno = 3 (0x3), region = 118 }
 0x51f   :  { %1787 = vsyncpa [#allocation3], 1 }
 0x520   :  { %1789 = vsyncpa [#allocation3 + $0x1], 1 }
 0x521   :  { %1790 = vsyncpa [#allocation5], 1 }

</bundles_post_ra>
